<compile_context>
chip_gen: v7x
topology: tpu7x:2x2x1
jax: 0.10.0
libtpu: 0.0.40
codegen_flags: <defaults>
</compile_context>

<pallas_src>
import functools

import jax
import jax.numpy as jnp
from jax import lax
from jax.experimental import pallas as pl
from jax.experimental.pallas import tpu as pltpu


_LANES = 512                    # lane-dense tile width (multiple of 128)
_TILE_BYTES = 2 * 1024 * 1024   # ~2 MiB per tile buffer (4 buffers -> ~8 MiB VMEM)
_MIN_TILES = 4                  # aim for >=4 grid steps so megacore can split work


def _unreg_dropout_kernel(seed_ref, x_ref, o_ref, *, keep_thresh):
    # Counter-based PRNG: hash(global flat element index, seed).  Pure integer
    # VPU ops -> works on TPU and in interpret mode, deterministic for a fixed
    # seed and independent of the tiling chosen by the wrapper.
    block_rows, lanes = x_ref.shape
    row = lax.broadcasted_iota(jnp.int32, (block_rows, lanes), 0)
    col = lax.broadcasted_iota(jnp.int32, (block_rows, lanes), 1)
    base = pl.program_id(0) * block_rows
    idx = ((base + row) * lanes + col).astype(jnp.uint32)

    # lowbias32-style avalanche mixer; seed folded in via a large odd constant.
    h = idx ^ (seed_ref[0].astype(jnp.uint32) * jnp.uint32(0x9E3779B9))
    h = h ^ (h >> 16)
    h = h * jnp.uint32(0x7FEB352D)
    h = h ^ (h >> 15)
    h = h * jnp.uint32(0x846CA68B)
    h = h ^ (h >> 16)

    keep = h < jnp.uint32(keep_thresh)          # P(keep) = 1 - p, 2^-32 resolution
    xv = x_ref[...]
    o_ref[...] = jnp.where(keep, xv, jnp.zeros_like(xv))


def unreg_dropout(x, *, p=0.5, seed=0, training=True):
    """Unregularized dropout: x * Bernoulli(1-p) mask, no 1/(1-p) rescaling."""
    if p < 0.0 or p > 1.0:
        raise ValueError(
            "dropout probability has to be between 0 and 1, but got {}".format(p)
        )
    if not training or p == 0.0:
        return x                      # eval path: identity (no kernel needed)
    if p == 1.0:
        return jnp.zeros_like(x)      # everything dropped

    orig_shape = x.shape
    total = x.size
    itemsize = jnp.dtype(x.dtype).itemsize

    # Lane-dense 2-D slab: last dim = 512 (multiple of 128).
    rows = -(-total // _LANES)
    pad = rows * _LANES - total

    flat = x.reshape(-1)
    if pad:
        # TODO(synk): only the <512-element ragged tail needs padding, but
        # jnp.pad copies the whole flat array; acceptable because it only
        # triggers when total % 512 != 0.
        flat = jnp.pad(flat, (0, pad))
    x2d = flat.reshape(rows, _LANES)

    # Packed-sublane multiple for the dtype: 8 (32-bit), 16 (16-bit), 32 (8-bit).
    sub = {1: 32, 2: 16}.get(itemsize, 8)
    max_block_rows = max(sub, (_TILE_BYTES // (_LANES * itemsize)) // sub * sub)
    target_rows = -(-rows // _MIN_TILES)                      # aim for >= _MIN_TILES tiles
    block_rows = min(max_block_rows, -(-target_rows // sub) * sub)
    if block_rows >= rows:
        block_rows = rows   # single block; full-extent dim is exempt from the (8,128) rule
    grid = -(-rows // block_rows)   # partial last block handled by Pallas masking

    keep_thresh = min(int(round((1.0 - p) * (1 << 32))), (1 << 32) - 1)
    kernel = functools.partial(_unreg_dropout_kernel, keep_thresh=keep_thresh)
    seed_arr = jnp.asarray([seed], dtype=jnp.int32)

    out2d = pl.pallas_call(
        kernel,
        out_shape=jax.ShapeDtypeStruct((rows, _LANES), x.dtype),
        grid_spec=pltpu.PrefetchScalarGridSpec(
            num_scalar_prefetch=1,
            grid=(grid,),
            in_specs=[
                pl.BlockSpec((block_rows, _LANES), lambda i, sref: (i, 0)),
            ],
            out_specs=pl.BlockSpec((block_rows, _LANES), lambda i, sref: (i, 0)),
        ),
        compiler_params=pltpu.CompilerParams(
            dimension_semantics=("parallel",),
            vmem_limit_bytes=32 << 20,
        ),
        cost_estimate=pl.CostEstimate(
            flops=total,
            transcendentals=0,
            bytes_accessed=2 * total * itemsize,
        ),
    )(seed_arr, x2d)

    if pad:
        return out2d.reshape(-1)[:total].reshape(orig_shape)
    return out2d.reshape(orig_shape)


if __name__ == "__main__":
    key = jax.random.PRNGKey(0)
    x = jax.random.normal(key, (2, 4, 16, 16), dtype=jnp.float32)
    p = 0.5

    # Training path: random 0/1 mask, no rescaling.
    out = jax.block_until_ready(unreg_dropout(x, p=p, seed=0, training=True))
    assert out.shape == x.shape

    kept = (out != 0.0)
    # Every element is either exactly x (kept) or exactly 0 (dropped).
    assert jnp.allclose(out, x * kept.astype(x.dtype)), "output not in {x, 0}"
    frac = float(jnp.mean(kept.astype(jnp.float32)))
    assert 0.35 < frac < 0.65, f"keep fraction {frac} inconsistent with p={p}"

    # Eval path: identity.
    out_eval = jax.block_until_ready(unreg_dropout(x, p=p, seed=0, training=False))
    assert jnp.array_equal(out_eval, x)

    print("KERNEL_OK")
</pallas_src>

<mosaic_0001>
module attributes {stable_mosaic.version = 11 : i64} {
  func.func @_unreg_dropout_kernel(%arg0: i32, %arg1: memref<1xi32, #tpu.memory_space<smem>>, %arg2: memref<4x512xf32, #tpu.memory_space<vmem>>, %arg3: memref<4x512xf32, #tpu.memory_space<vmem>>) attributes {dimension_semantics = [#tpu.dimension_semantics<parallel>], iteration_bounds = array<i64: 1>, scalar_prefetch = 1 : i64, scratch_operands = 0 : i64, tpu.core_type = #tpu.core_type<tc>, window_params = [{transform_indices = @transform_0, window_bounds = array<i64: 4, 512>}, {transform_indices = @transform_1, window_bounds = array<i64: 4, 512>}]} {
    %0 = tpu.iota {dimensions = array<i32: 0>} : vector<4x512xi32>
    %1 = tpu.iota {dimensions = array<i32: 1>} : vector<4x512xi32>
    %c4_i32 = arith.constant 4 : i32
    %2 = arith.muli %arg0, %c4_i32 : i32
    %3 = vector.broadcast %2 : i32 to vector<4x512xi32>
    %4 = arith.addi %3, %0 : vector<4x512xi32>
    %c512_i32 = arith.constant 512 : i32
    %5 = vector.broadcast %c512_i32 : i32 to vector<4x512xi32>
    %6 = arith.muli %4, %5 : vector<4x512xi32>
    %7 = arith.addi %6, %1 : vector<4x512xi32>
    %c0 = arith.constant 0 : index
    %8 = memref.load %arg1[%c0] : memref<1xi32, #tpu.memory_space<smem>>
    %c-1640531527_i32 = arith.constant -1640531527 : i32
    %9 = arith.muli %8, %c-1640531527_i32 : i32
    %10 = vector.broadcast %9 : i32 to vector<4x512xi32>
    %11 = arith.xori %7, %10 : vector<4x512xi32>
    %c16_i32 = arith.constant 16 : i32
    %12 = vector.broadcast %c16_i32 : i32 to vector<4x512xi32>
    %13 = arith.shrui %11, %12 : vector<4x512xi32>
    %14 = arith.xori %11, %13 : vector<4x512xi32>
    %c2146121005_i32 = arith.constant 2146121005 : i32
    %15 = vector.broadcast %c2146121005_i32 : i32 to vector<4x512xi32>
    %16 = arith.muli %14, %15 : vector<4x512xi32>
    %c15_i32 = arith.constant 15 : i32
    %17 = vector.broadcast %c15_i32 : i32 to vector<4x512xi32>
    %18 = arith.shrui %16, %17 : vector<4x512xi32>
    %19 = arith.xori %16, %18 : vector<4x512xi32>
    %c-2073254261_i32 = arith.constant -2073254261 : i32
    %20 = vector.broadcast %c-2073254261_i32 : i32 to vector<4x512xi32>
    %21 = arith.muli %19, %20 : vector<4x512xi32>
    %c16_i32_0 = arith.constant 16 : i32
    %22 = vector.broadcast %c16_i32_0 : i32 to vector<4x512xi32>
    %23 = arith.shrui %21, %22 : vector<4x512xi32>
    %24 = arith.xori %21, %23 : vector<4x512xi32>
    %c-2147483648_i32 = arith.constant -2147483648 : i32
    %25 = vector.broadcast %c-2147483648_i32 : i32 to vector<4x512xi32>
    %26 = arith.cmpi ult, %24, %25 : vector<4x512xi32>
    %c0_1 = arith.constant 0 : index
    %c0_2 = arith.constant 0 : index
    %27 = vector.load %arg2[%c0_1, %c0_2] : memref<4x512xf32, #tpu.memory_space<vmem>>, vector<4x512xf32>
    %cst = arith.constant 0.000000e+00 : f32
    %28 = vector.broadcast %cst : f32 to vector<4x512xf32>
    %29 = arith.select %26, %27, %28 : vector<4x512xi1>, vector<4x512xf32>
    %c0_3 = arith.constant 0 : index
    %c0_4 = arith.constant 0 : index
    %30 = vector.load %arg3[%c0_3, %c0_4] : memref<4x512xf32, #tpu.memory_space<vmem>>, vector<4x512xf32>
    tpu.vector_store %arg3[%c0_3, %c0_4], %29 {strides = array<i32>} : memref<4x512xf32, #tpu.memory_space<vmem>>, vector<4x512xf32>,
    return
  }
  func.func @transform_0(%arg0: i32, %arg1: memref<1xi32, #tpu.memory_space<smem>>) -> (i32, i32) {
    %c0_i32 = arith.constant 0 : i32
    %c0_i32_0 = arith.constant 0 : i32
    return %arg0, %c0_i32 : i32, i32
  }
  func.func @transform_1(%arg0: i32, %arg1: memref<1xi32, #tpu.memory_space<smem>>) -> (i32, i32) {
    %c0_i32 = arith.constant 0 : i32
    %c0_i32_0 = arith.constant 0 : i32
    return %arg0, %c0_i32 : i32, i32
  }
}

</mosaic_0001>

<bundles_post_ra>
// kernel: tpu_custom_call.1
= control target key start
LH: loop header
LB: loop body
LE: loop exit
PB: predicated region body
PF: predicated region fallthrough
CT: control target
= control target key end

     0   :  { %8 = vsyncpa [#allocation5], 0  ;;  %s214_s0 = inlined_call_operand.<no memory space> [shape: s32[1], index: 0, kind: input, shape index: {}]   ;;  %s215_s1 = inlined_call_operand.hbm [shape: f32[4,512], index: 1, kind: input, shape index: {}]   ;;  %s216_s2 = inlined_call_operand.hbm [shape: f32[4,512], index: 2, kind: output, shape index: {}]  }
   0x1   :  { %9 = vsyncpa [#allocation6], 0  ;;  %s170_s9 = smov [#allocation4]   ;;  %s122_s13 = scalar_lea.hbm %s215_s1, 256 }
   0x2   :  { %s16_s10 = sshll.u32 %s170_s9, 4  ;;  %p123_p0 = scmp.ne.s32.totalorder %s215_s1, %s122_s13  ;;  %s17_s10 = int_to_ptr.vmem [resolvable:$true] %s16_s10 }
   0x3   :  { %p126_p1 = scmp.lt.u32.totalorder %s122_s13, %s215_s1 }
   0x5   :  { %p128_p2 = pnand %p126_p1, %p123_p0 }
   0x7   :  { %131 = shalt.err (!%p128_p2)
}
   0x8   :  { %s132_s18 = scalar_lea.vmem %s17_s10, 256  ;;  %p137_p4 = scmp.lt.s32.totalorder %s17_s10, %s17_s10 }
   0x9   :  { %p133_p3 = scmp.ne.s32.totalorder %s17_s10, %s132_s18  ;;  %p138_p5 = scmp.lt.s32.totalorder %s132_s18, %s132_s18 }
   0xb   :  { %p139_p6 = por %p138_p5, %p137_p4 }
   0xd   :  { %p140_p7 = pnand %p139_p6, %p133_p3 }
   0xf   :  { %143 = shalt.err (!%p140_p7)
}
  0x10   :  { %19 = dma.hbm_to_vmem [thread:$0]  %s215_s1, 256, %s17_s10, [#allocation5]  }
  0x11   :  { %166 = dma.done.wait [#allocation5], 256  }
  0x12   :  { %167 = vsyncadd [#allocation5], 4294967040  ;;  %v23_v0 = vlaneseq  ;;  %s39_s23 = smul.u32 2654435769, %s214_s0  ;;  %v81_v38 = vld [vmem:[#allocation4] sm:$0xff]  ;;  %v82_v41 = vld [vmem:[#allocation4 + $0x8] sm:$0xff] }
  0x13   :  { %v85_v44 = vcombine.high %v81_v38, %v81_v38  ;;  %v86_v49 = vcombine.high %v82_v41, %v82_v41  ;;  %s171_s0 = smov [#allocation7]  }
  0x14   :  { %v24_v1 = vshrl.u32 %v23_v0, 7  ;;  %v26_v2 = vand.u32 127, %v23_v0  ;;  %v40_v7 = vstv %s39_s23  ;;  %s109_s1 = sshll.u32 %s171_s0, 4  ;;  %s110_s1 = int_to_ptr.vmem [resolvable:$true] %s109_s1 }
  0x15   :  { %s144_s24 = scalar_lea.vmem %s110_s1, 256  ;;  %p149_p9 = scmp.lt.s32.totalorder %s110_s1, %s110_s1 }
  0x16   :  { %v27_v3 = vadd.s32 128, %v26_v2  ;;  %v33_v4 = vmul.u32 512, %v24_v1  ;;  %v28_v5 = vadd.s32 256, %v26_v2  ;;  %v29_v6 = vadd.s32 384, %v26_v2  ;;  %p145_p8 = scmp.ne.s32.totalorder %s110_s1, %s144_s24  ;;  %p150_p10 = scmp.lt.s32.totalorder %s144_s24, %s144_s24 }
  0x18   :  { %v34_v8 = vadd.s32 %v33_v4, %v26_v2  ;;  %v35_v9 = vadd.s32 %v33_v4, %v27_v3  ;;  %v36_v10 = vadd.s32 %v33_v4, %v28_v5  ;;  %v37_v11 = vadd.s32 %v33_v4, %v29_v6  ;;  %p151_p11 = por %p150_p10, %p149_p9 }
  0x1a   :  { %v41_v12 = vxor.u32 %v40_v7, %v34_v8  ;;  %v42_v13 = vxor.u32 %v40_v7, %v35_v9  ;;  %v43_v14 = vxor.u32 %v40_v7, %v36_v10  ;;  %v44_v15 = vxor.u32 %v40_v7, %v37_v11  ;;  %p152_p12 = pnand %p151_p11, %p145_p8 }
  0x1c   :  { %v45_v16 = vshrl.u32 %v41_v12, 16  ;;  %v46_v17 = vshrl.u32 %v42_v13, 16  ;;  %v47_v18 = vshrl.u32 %v43_v14, 16  ;;  %v48_v19 = vshrl.u32 %v44_v15, 16 }
  0x1e   :  { %v49_v20 = vxor.u32 %v45_v16, %v41_v12  ;;  %v50_v21 = vxor.u32 %v46_v17, %v42_v13  ;;  %v51_v22 = vxor.u32 %v47_v18, %v43_v14  ;;  %v52_v23 = vxor.u32 %v48_v19, %v44_v15 }
  0x20   :  { %v53_v24 = vmul.u32 2146121005, %v49_v20  ;;  %v54_v25 = vmul.u32 2146121005, %v50_v21 }
  0x21   :  { %v55_v26 = vmul.u32 2146121005, %v51_v22  ;;  %v56_v27 = vmul.u32 2146121005, %v52_v23 }
  0x22   :  { %v57_v28 = vshrl.u32 %v53_v24, 15  ;;  %v58_v29 = vshrl.u32 %v54_v25, 15 }
  0x23   :  { %v59_v30 = vshrl.u32 %v55_v26, 15  ;;  %v60_v31 = vshrl.u32 %v56_v27, 15 }
  0x24   :  { %v61_v32 = vxor.u32 %v57_v28, %v53_v24  ;;  %v62_v33 = vxor.u32 %v58_v29, %v54_v25 }
  0x25   :  { %v63_v34 = vxor.u32 %v59_v30, %v55_v26  ;;  %v64_v35 = vxor.u32 %v60_v31, %v56_v27 }
  0x26   :  { %v65_v36 = vmul.u32 2221713035, %v61_v32  ;;  %v66_v37 = vmul.u32 2221713035, %v62_v33 }
  0x27   :  { %v67_v39 = vmul.u32 2221713035, %v63_v34  ;;  %v68_v40 = vmul.u32 2221713035, %v64_v35 }
  0x28   :  { %v69_v42 = vshrl.u32 %v65_v36, 16  ;;  %v70_v43 = vshrl.u32 %v66_v37, 16 }
  0x29   :  { %v71_v45 = vshrl.u32 %v67_v39, 16  ;;  %v72_v46 = vshrl.u32 %v68_v40, 16 }
  0x2a   :  { %v73_v47 = vxor.u32 %v69_v42, %v65_v36  ;;  %v74_v48 = vxor.u32 %v70_v43, %v66_v37 }
  0x2b   :  { %v75_v50 = vxor.u32 %v71_v45, %v67_v39  ;;  %v76_v51 = vxor.u32 %v72_v46, %v68_v40 }
  0x2c   :  { %vm77_vm0 = vcmp.lt.u32.totalorder %v73_v47, 2147483648  ;;  %vm78_vm1 = vcmp.lt.u32.totalorder %v74_v48, 2147483648 }
  0x2d   :  { %v89_v52 = vsel %vm77_vm0, %v81_v38, 0.0  ;;  %v90_v53 = vsel %vm78_vm1, %v85_v44, 0.0  ;;  %vm79_vm2 = vcmp.lt.u32.totalorder %v75_v50, 2147483648  ;;  %vm80_vm3 = vcmp.lt.u32.totalorder %v76_v51, 2147483648 }
  0x2e   :  { %v97_v54 = vcombine.low %v89_v52, %v90_v53  ;;  %v91_v55 = vsel %vm79_vm2, %v82_v41, 0.0  ;;  %v92_v56 = vsel %vm80_vm3, %v86_v49, 0.0 }
  0x2f   :  { %v98_v57 = vcombine.low %v91_v55, %v92_v56 }
  0x30   :  { %101 = vst [vmem:[#allocation7] sm:$0xff] %v97_v54 }
  0x31   :  { %102 = vst [vmem:[#allocation7 + $0x8] sm:$0xff] %v98_v57 }
  0x32   :  { %155 = shalt.err (!%p152_p12)
}
  0x33   :  { %s156_s27 = scalar_lea.hbm %s216_s2, 256 }
  0x34   :  { %p157_p13 = scmp.ne.s32.totalorder %s216_s2, %s156_s27  ;;  %p160_p0 = scmp.lt.u32.totalorder %s156_s27, %s216_s2 }
  0x36   :  { %p162_p1 = pnand %p160_p0, %p157_p13 }
  0x38   :  { %165 = shalt.err (!%p162_p1)
}
  0x39   :  { %112 = dma.vmem_to_hbm [thread:$0]  %s110_s1, 256, %s216_s2, [#allocation6]  }
  0x3a   :  { %168 = dma.done.wait [#allocation6], 256  }
  0x3b   :  { %169 = vsyncadd [#allocation6], 4294967040 }
  0x3c   :  { %116 = vsyncpa [#allocation5], 1 }
  0x3d   :  { %117 = vsyncpa [#allocation6], 1 }

</bundles_post_ra>
